<compile_context>
chip_gen: v5e
topology: v5e:2x2
jax: 0.10.0
libtpu: 0.0.40
codegen_flags: <defaults>
</compile_context>

<pallas_src>
import functools

import jax
import jax.numpy as jnp
import numpy as np
from jax.experimental import pallas as pl
from jax.experimental.pallas import tpu as pltpu

EPS = 1e-5


def _resblock_kernel(x_ref, w1_ref, sb1_ref, w2_ref, sb2_ref, o_ref, *, H, W):
    """Fused residual block for one image in channel-planar (C, H*W) layout.

    x_ref  : (1, C, HW)  input image, channels in sublanes, flat spatial in lanes
    w1_ref : (9, C, C)   conv1 taps, tap = ky*3+kx, each (C_out, C_in)
    sb1_ref: (2, C, 1)   [scale, shift] folding conv1 bias + bn1 (eval mode)
    w2_ref : (9, C, C)   conv2 taps
    sb2_ref: (2, C, 1)   [scale, shift] folding conv2 bias + bn2
    o_ref  : (1, C, HW)  output, same layout as input
    """
    HW = H * W
    x = x_ref[0]                                     # (C, HW) f32 — only image read

    # ---- border masks from an in-kernel iota (no HBM mask input) -----------
    p = jax.lax.broadcasted_iota(jnp.int32, (1, HW), 1)
    if W & (W - 1) == 0:
        px = jnp.bitwise_and(p, W - 1)               # p % W (power-of-two width)
    else:
        px = jnp.remainder(p, W)
    row_ok = {0: p >= W, 1: None, 2: p < HW - W}     # tap needs row y-1 / y+1
    col_ok = {0: px >= 1, 1: None, 2: px < W - 1}    # tap needs col x-1 / x+1

    masks = []                                       # one (1, HW) f32 mask per tap
    for ky in range(3):
        for kx in range(3):
            conds = [c for c in (row_ok[ky], col_ok[kx]) if c is not None]
            if not conds:
                masks.append(None)                   # center tap: never padded
            else:
                c = conds[0]
                for extra in conds[1:]:
                    c = jnp.logical_and(c, extra)
                masks.append(jnp.where(c, 1.0, 0.0))

    def conv3x3(inp, w_ref):
        # Tap (ky, kx) reads source pixel (y+ky-1, x+kx-1): a lane rotation of
        # the flat spatial axis by s = (ky-1)*W + (kx-1); contributions that
        # would come from the zero-padding border are killed by the tap mask.
        terms = []
        for ky in range(3):
            for kx in range(3):
                t = ky * 3 + kx
                s = (ky - 1) * W + (kx - 1)
                src = inp if s == 0 else pltpu.roll(inp, shift=(-s) % HW, axis=1)
                if masks[t] is not None:
                    src = src * masks[t]
                terms.append(jnp.dot(w_ref[t], src,
                                     preferred_element_type=jnp.float32))
        while len(terms) > 1:                        # balanced-tree accumulation
            nxt = [terms[i] + terms[i + 1] for i in range(0, len(terms) - 1, 2)]
            if len(terms) % 2:
                nxt.append(terms[-1])
            terms = nxt
        return terms[0]

    # ---- conv1 + bn1 + relu --------------------------------------------------
    mid = jnp.maximum(conv3x3(x, w1_ref) * sb1_ref[0] + sb1_ref[1], 0.0)
    # ---- conv2 + bn2 + residual + relu ---------------------------------------
    out = conv3x3(mid, w2_ref) * sb2_ref[0] + sb2_ref[1] + x
    o_ref[0] = jnp.maximum(out, 0.0).astype(o_ref.dtype)


def residual_block(x_nchw, params):
    """Run the fused residual block. Input/output are NCHW (PyTorch convention)."""
    N, C, H, W = x_nchw.shape
    HW = H * W
    # NCHW flattened spatially IS the channel-planar layout: free reshape.
    x = x_nchw.reshape(N, C, HW).astype(jnp.float32)

    def fold(conv_w, conv_b, gamma, beta, mean, var):
        # (C_out, C_in, 3, 3) -> (ky, kx, C_out, C_in) -> (9, C_out, C_in)
        w_taps = jnp.transpose(conv_w, (2, 3, 0, 1)).reshape(9, C, C)
        scale = gamma / jnp.sqrt(var + EPS)
        shift = beta + scale * (conv_b - mean)
        sb = jnp.stack([scale, shift]).reshape(2, C, 1)
        return w_taps.astype(jnp.float32), sb.astype(jnp.float32)

    w1t, sb1 = fold(params["w1"], params["b1"], params["g1"], params["be1"],
                    params["m1"], params["v1"])
    w2t, sb2 = fold(params["w2"], params["b2"], params["g2"], params["be2"],
                    params["m2"], params["v2"])

    flops = N * 2 * 2 * 9 * HW * C * C               # 2 convs, 2 flops/MAC, H*W pixels
    bytes_accessed = 4 * (2 * N * C * HW + 2 * 9 * C * C + 2 * 2 * C)

    kernel = functools.partial(_resblock_kernel, H=H, W=W)

    out = pl.pallas_call(
        kernel,
        out_shape=jax.ShapeDtypeStruct((N, C, HW), jnp.float32),
        grid=(N,),
        in_specs=[
            pl.BlockSpec((1, C, HW), lambda n: (n, 0, 0)),
            pl.BlockSpec((9, C, C), lambda n: (0, 0, 0)),
            pl.BlockSpec((2, C, 1), lambda n: (0, 0, 0)),
            pl.BlockSpec((9, C, C), lambda n: (0, 0, 0)),
            pl.BlockSpec((2, C, 1), lambda n: (0, 0, 0)),
        ],
        out_specs=pl.BlockSpec((1, C, HW), lambda n: (n, 0, 0)),
        compiler_params=pltpu.CompilerParams(
            # No cross-step state: the batch axis may shard across cores (v7x).
            dimension_semantics=("parallel",),
            vmem_limit_bytes=32 * 1024 * 1024),
        cost_estimate=pl.CostEstimate(flops=flops, transcendentals=0,
                                      bytes_accessed=bytes_accessed),
    )(x, w1t, sb1, w2t, sb2)

    return out.reshape(N, C, H, W)                   # channel-planar -> NCHW (free)


def residual_block_ref(x, p):
    """Pure-JAX reference mirroring the PyTorch forward (eval-mode BN)."""
    def conv(x, w, b):
        y = jax.lax.conv_general_dilated(
            x, w, window_strides=(1, 1), padding="SAME",
            dimension_numbers=("NCHW", "OIHW", "NCHW"))
        return y + b[None, :, None, None]

    def bn(x, g, be, m, v):
        return (x - m[None, :, None, None]) / jnp.sqrt(
            v[None, :, None, None] + EPS) * g[None, :, None, None] + be[None, :, None, None]

    out = jax.nn.relu(bn(conv(x, p["w1"], p["b1"]), p["g1"], p["be1"], p["m1"], p["v1"]))
    out = bn(conv(out, p["w2"], p["b2"]), p["g2"], p["be2"], p["m2"], p["v2"])
    return jax.nn.relu(out + x)


def make_params(key, channels):
    ks = jax.random.split(key, 10)
    C = channels
    return {
        "w1": 0.1 * jax.random.normal(ks[0], (C, C, 3, 3), jnp.float32),
        "b1": 0.05 * jax.random.normal(ks[1], (C,), jnp.float32),
        "g1": 1.0 + 0.1 * jax.random.normal(ks[2], (C,), jnp.float32),
        "be1": 0.05 * jax.random.normal(ks[3], (C,), jnp.float32),
        "m1": 0.05 * jax.random.normal(ks[4], (C,), jnp.float32),
        "v1": 1.0 + 0.1 * jax.random.uniform(ks[5], (C,), jnp.float32),
        "w2": 0.1 * jax.random.normal(ks[6], (C, C, 3, 3), jnp.float32),
        "b2": 0.05 * jax.random.normal(ks[7], (C,), jnp.float32),
        "g2": 1.0 + 0.1 * jax.random.normal(ks[8], (C,), jnp.float32),
        "be2": 0.05 * jax.random.normal(ks[9], (C,), jnp.float32),
        "m2": 0.05 * jax.random.normal(ks[4], (C,), jnp.float32) * 0.5,
        "v2": 1.0 + 0.1 * jax.random.uniform(ks[5], (C,), jnp.float32) * 0.5,
    }


if __name__ == "__main__":
    key = jax.random.PRNGKey(0)
    k_x, k_p = jax.random.split(key)

    N, C, H, W = 2, 4, 16, 16
    x = jax.random.normal(k_x, (N, C, H, W), jnp.float32)
    params = make_params(k_p, C)

    out = residual_block(x, params)
    out = jax.block_until_ready(out)

    ref = jax.block_until_ready(residual_block_ref(x, params))
    np.testing.assert_allclose(np.asarray(out), np.asarray(ref),
                               rtol=1e-4, atol=1e-4)

    print("KERNEL_OK")
</pallas_src>

<mosaic_0001>
module attributes {stable_mosaic.version = 11 : i64} {
  func.func @_resblock_kernel(%arg0: i32, %arg1: memref<1x4x256xf32, #tpu.memory_space<vmem>>, %arg2: memref<9x4x4xf32, #tpu.memory_space<vmem>>, %arg3: memref<2x4x1xf32, #tpu.memory_space<vmem>>, %arg4: memref<9x4x4xf32, #tpu.memory_space<vmem>>, %arg5: memref<2x4x1xf32, #tpu.memory_space<vmem>>, %arg6: memref<1x4x256xf32, #tpu.memory_space<vmem>>) attributes {dimension_semantics = [#tpu.dimension_semantics<parallel>], iteration_bounds = array<i64: 2>, scalar_prefetch = 0 : i64, scratch_operands = 0 : i64, tpu.core_type = #tpu.core_type<tc>, window_params = [{transform_indices = @transform_0, window_bounds = array<i64: 1, 4, 256>}, {pipeline_mode = #tpu.pipeline_mode<synchronous>, transform_indices = @transform_1, window_bounds = array<i64: 9, 4, 4>}, {pipeline_mode = #tpu.pipeline_mode<synchronous>, transform_indices = @transform_2, window_bounds = array<i64: 2, 4, 1>}, {pipeline_mode = #tpu.pipeline_mode<synchronous>, transform_indices = @transform_3, window_bounds = array<i64: 9, 4, 4>}, {pipeline_mode = #tpu.pipeline_mode<synchronous>, transform_indices = @transform_4, window_bounds = array<i64: 2, 4, 1>}, {transform_indices = @transform_5, window_bounds = array<i64: 1, 4, 256>}]} {
    %c0 = arith.constant 0 : index
    %c0_0 = arith.constant 0 : index
    %c0_1 = arith.constant 0 : index
    %0 = vector.load %arg1[%c0, %c0_0, %c0_1] : memref<1x4x256xf32, #tpu.memory_space<vmem>>, vector<1x4x256xf32>
    %1 = vector.shape_cast %0 : vector<1x4x256xf32> to vector<4x256xf32>
    %2 = tpu.iota {dimensions = array<i32: 1>} : vector<1x256xi32>
    %c15_i32 = arith.constant 15 : i32
    %3 = vector.broadcast %c15_i32 : i32 to vector<1x256xi32>
    %4 = arith.andi %2, %3 : vector<1x256xi32>
    %c16_i32 = arith.constant 16 : i32
    %5 = vector.broadcast %c16_i32 : i32 to vector<1x256xi32>
    %6 = arith.cmpi sge, %2, %5 : vector<1x256xi32>
    %c240_i32 = arith.constant 240 : i32
    %7 = vector.broadcast %c240_i32 : i32 to vector<1x256xi32>
    %8 = arith.cmpi slt, %2, %7 : vector<1x256xi32>
    %c1_i32 = arith.constant 1 : i32
    %9 = vector.broadcast %c1_i32 : i32 to vector<1x256xi32>
    %10 = arith.cmpi sge, %4, %9 : vector<1x256xi32>
    %c15_i32_2 = arith.constant 15 : i32
    %11 = vector.broadcast %c15_i32_2 : i32 to vector<1x256xi32>
    %12 = arith.cmpi slt, %4, %11 : vector<1x256xi32>
    %13 = arith.andi %6, %10 : vector<1x256xi1>
    %cst = arith.constant 1.000000e+00 : f32
    %cst_3 = arith.constant 0.000000e+00 : f32
    %14 = vector.broadcast %cst : f32 to vector<1x256xf32>
    %15 = vector.broadcast %cst_3 : f32 to vector<1x256xf32>
    %16 = arith.select %13, %14, %15 : vector<1x256xi1>, vector<1x256xf32>
    %cst_4 = arith.constant 1.000000e+00 : f32
    %cst_5 = arith.constant 0.000000e+00 : f32
    %17 = vector.broadcast %cst_4 : f32 to vector<1x256xf32>
    %18 = vector.broadcast %cst_5 : f32 to vector<1x256xf32>
    %19 = arith.select %6, %17, %18 : vector<1x256xi1>, vector<1x256xf32>
    %20 = arith.andi %6, %12 : vector<1x256xi1>
    %cst_6 = arith.constant 1.000000e+00 : f32
    %cst_7 = arith.constant 0.000000e+00 : f32
    %21 = vector.broadcast %cst_6 : f32 to vector<1x256xf32>
    %22 = vector.broadcast %cst_7 : f32 to vector<1x256xf32>
    %23 = arith.select %20, %21, %22 : vector<1x256xi1>, vector<1x256xf32>
    %cst_8 = arith.constant 1.000000e+00 : f32
    %cst_9 = arith.constant 0.000000e+00 : f32
    %24 = vector.broadcast %cst_8 : f32 to vector<1x256xf32>
    %25 = vector.broadcast %cst_9 : f32 to vector<1x256xf32>
    %26 = arith.select %10, %24, %25 : vector<1x256xi1>, vector<1x256xf32>
    %cst_10 = arith.constant 1.000000e+00 : f32
    %cst_11 = arith.constant 0.000000e+00 : f32
    %27 = vector.broadcast %cst_10 : f32 to vector<1x256xf32>
    %28 = vector.broadcast %cst_11 : f32 to vector<1x256xf32>
    %29 = arith.select %12, %27, %28 : vector<1x256xi1>, vector<1x256xf32>
    %30 = arith.andi %8, %10 : vector<1x256xi1>
    %cst_12 = arith.constant 1.000000e+00 : f32
    %cst_13 = arith.constant 0.000000e+00 : f32
    %31 = vector.broadcast %cst_12 : f32 to vector<1x256xf32>
    %32 = vector.broadcast %cst_13 : f32 to vector<1x256xf32>
    %33 = arith.select %30, %31, %32 : vector<1x256xi1>, vector<1x256xf32>
    %cst_14 = arith.constant 1.000000e+00 : f32
    %cst_15 = arith.constant 0.000000e+00 : f32
    %34 = vector.broadcast %cst_14 : f32 to vector<1x256xf32>
    %35 = vector.broadcast %cst_15 : f32 to vector<1x256xf32>
    %36 = arith.select %8, %34, %35 : vector<1x256xi1>, vector<1x256xf32>
    %37 = arith.andi %8, %12 : vector<1x256xi1>
    %cst_16 = arith.constant 1.000000e+00 : f32
    %cst_17 = arith.constant 0.000000e+00 : f32
    %38 = vector.broadcast %cst_16 : f32 to vector<1x256xf32>
    %39 = vector.broadcast %cst_17 : f32 to vector<1x256xf32>
    %40 = arith.select %37, %38, %39 : vector<1x256xi1>, vector<1x256xf32>
    %c17_i32 = arith.constant 17 : i32
    %41 = tpu.dynamic_rotate %1 by %c17_i32 dim 1 : vector<4x256xf32>, i32 -> vector<4x256xf32>
    %42 = vector.broadcast %16 : vector<1x256xf32> to vector<4x256xf32>
    %43 = arith.mulf %41, %42 : vector<4x256xf32>
    %c0_18 = arith.constant 0 : index
    %c0_19 = arith.constant 0 : index
    %c0_20 = arith.constant 0 : index
    %44 = vector.load %arg2[%c0_18, %c0_19, %c0_20] : memref<9x4x4xf32, #tpu.memory_space<vmem>>, vector<1x4x4xf32>
    %45 = vector.shape_cast %44 : vector<1x4x4xf32> to vector<4x4xf32>
    %cst_21 = arith.constant dense<0.000000e+00> : vector<4x256xf32>
    %46 = tpu.matmul %45, %43, %cst_21 {dimension_numbers = #tpu.dot_dimension_numbers<[1], [0], [0], [1], [0, 0, 1, 1], [], []>} : vector<4x4xf32>, vector<4x256xf32>, vector<4x256xf32> -> vector<4x256xf32>
    %c16_i32_22 = arith.constant 16 : i32
    %47 = tpu.dynamic_rotate %1 by %c16_i32_22 dim 1 : vector<4x256xf32>, i32 -> vector<4x256xf32>
    %48 = vector.broadcast %19 : vector<1x256xf32> to vector<4x256xf32>
    %49 = arith.mulf %47, %48 : vector<4x256xf32>
    %c1 = arith.constant 1 : index
    %c0_23 = arith.constant 0 : index
    %c0_24 = arith.constant 0 : index
    %50 = vector.load %arg2[%c1, %c0_23, %c0_24] : memref<9x4x4xf32, #tpu.memory_space<vmem>>, vector<1x4x4xf32>
    %51 = vector.shape_cast %50 : vector<1x4x4xf32> to vector<4x4xf32>
    %cst_25 = arith.constant dense<0.000000e+00> : vector<4x256xf32>
    %52 = tpu.matmul %51, %49, %cst_25 {dimension_numbers = #tpu.dot_dimension_numbers<[1], [0], [0], [1], [0, 0, 1, 1], [], []>} : vector<4x4xf32>, vector<4x256xf32>, vector<4x256xf32> -> vector<4x256xf32>
    %c15_i32_26 = arith.constant 15 : i32
    %53 = tpu.dynamic_rotate %1 by %c15_i32_26 dim 1 : vector<4x256xf32>, i32 -> vector<4x256xf32>
    %54 = vector.broadcast %23 : vector<1x256xf32> to vector<4x256xf32>
    %55 = arith.mulf %53, %54 : vector<4x256xf32>
    %c2 = arith.constant 2 : index
    %c0_27 = arith.constant 0 : index
    %c0_28 = arith.constant 0 : index
    %56 = vector.load %arg2[%c2, %c0_27, %c0_28] : memref<9x4x4xf32, #tpu.memory_space<vmem>>, vector<1x4x4xf32>
    %57 = vector.shape_cast %56 : vector<1x4x4xf32> to vector<4x4xf32>
    %cst_29 = arith.constant dense<0.000000e+00> : vector<4x256xf32>
    %58 = tpu.matmul %57, %55, %cst_29 {dimension_numbers = #tpu.dot_dimension_numbers<[1], [0], [0], [1], [0, 0, 1, 1], [], []>} : vector<4x4xf32>, vector<4x256xf32>, vector<4x256xf32> -> vector<4x256xf32>
    %c1_i32_30 = arith.constant 1 : i32
    %59 = tpu.dynamic_rotate %1 by %c1_i32_30 dim 1 : vector<4x256xf32>, i32 -> vector<4x256xf32>
    %60 = vector.broadcast %26 : vector<1x256xf32> to vector<4x256xf32>
    %61 = arith.mulf %59, %60 : vector<4x256xf32>
    %c3 = arith.constant 3 : index
    %c0_31 = arith.constant 0 : index
    %c0_32 = arith.constant 0 : index
    %62 = vector.load %arg2[%c3, %c0_31, %c0_32] : memref<9x4x4xf32, #tpu.memory_space<vmem>>, vector<1x4x4xf32>
    %63 = vector.shape_cast %62 : vector<1x4x4xf32> to vector<4x4xf32>
    %cst_33 = arith.constant dense<0.000000e+00> : vector<4x256xf32>
    %64 = tpu.matmul %63, %61, %cst_33 {dimension_numbers = #tpu.dot_dimension_numbers<[1], [0], [0], [1], [0, 0, 1, 1], [], []>} : vector<4x4xf32>, vector<4x256xf32>, vector<4x256xf32> -> vector<4x256xf32>
    %c4 = arith.constant 4 : index
    %c0_34 = arith.constant 0 : index
    %c0_35 = arith.constant 0 : index
    %65 = vector.load %arg2[%c4, %c0_34, %c0_35] : memref<9x4x4xf32, #tpu.memory_space<vmem>>, vector<1x4x4xf32>
    %66 = vector.shape_cast %65 : vector<1x4x4xf32> to vector<4x4xf32>
    %cst_36 = arith.constant dense<0.000000e+00> : vector<4x256xf32>
    %67 = tpu.matmul %66, %1, %cst_36 {dimension_numbers = #tpu.dot_dimension_numbers<[1], [0], [0], [1], [0, 0, 1, 1], [], []>} : vector<4x4xf32>, vector<4x256xf32>, vector<4x256xf32> -> vector<4x256xf32>
    %c255_i32 = arith.constant 255 : i32
    %68 = tpu.dynamic_rotate %1 by %c255_i32 dim 1 : vector<4x256xf32>, i32 -> vector<4x256xf32>
    %69 = vector.broadcast %29 : vector<1x256xf32> to vector<4x256xf32>
    %70 = arith.mulf %68, %69 : vector<4x256xf32>
    %c5 = arith.constant 5 : index
    %c0_37 = arith.constant 0 : index
    %c0_38 = arith.constant 0 : index
    %71 = vector.load %arg2[%c5, %c0_37, %c0_38] : memref<9x4x4xf32, #tpu.memory_space<vmem>>, vector<1x4x4xf32>
    %72 = vector.shape_cast %71 : vector<1x4x4xf32> to vector<4x4xf32>
    %cst_39 = arith.constant dense<0.000000e+00> : vector<4x256xf32>
    %73 = tpu.matmul %72, %70, %cst_39 {dimension_numbers = #tpu.dot_dimension_numbers<[1], [0], [0], [1], [0, 0, 1, 1], [], []>} : vector<4x4xf32>, vector<4x256xf32>, vector<4x256xf32> -> vector<4x256xf32>
    %c241_i32 = arith.constant 241 : i32
    %74 = tpu.dynamic_rotate %1 by %c241_i32 dim 1 : vector<4x256xf32>, i32 -> vector<4x256xf32>
    %75 = vector.broadcast %33 : vector<1x256xf32> to vector<4x256xf32>
    %76 = arith.mulf %74, %75 : vector<4x256xf32>
    %c6 = arith.constant 6 : index
    %c0_40 = arith.constant 0 : index
    %c0_41 = arith.constant 0 : index
    %77 = vector.load %arg2[%c6, %c0_40, %c0_41] : memref<9x4x4xf32, #tpu.memory_space<vmem>>, vector<1x4x4xf32>
    %78 = vector.shape_cast %77 : vector<1x4x4xf32> to vector<4x4xf32>
    %cst_42 = arith.constant dense<0.000000e+00> : vector<4x256xf32>
    %79 = tpu.matmul %78, %76, %cst_42 {dimension_numbers = #tpu.dot_dimension_numbers<[1], [0], [0], [1], [0, 0, 1, 1], [], []>} : vector<4x4xf32>, vector<4x256xf32>, vector<4x256xf32> -> vector<4x256xf32>
    %c240_i32_43 = arith.constant 240 : i32
    %80 = tpu.dynamic_rotate %1 by %c240_i32_43 dim 1 : vector<4x256xf32>, i32 -> vector<4x256xf32>
    %81 = vector.broadcast %36 : vector<1x256xf32> to vector<4x256xf32>
    %82 = arith.mulf %80, %81 : vector<4x256xf32>
    %c7 = arith.constant 7 : index
    %c0_44 = arith.constant 0 : index
    %c0_45 = arith.constant 0 : index
    %83 = vector.load %arg2[%c7, %c0_44, %c0_45] : memref<9x4x4xf32, #tpu.memory_space<vmem>>, vector<1x4x4xf32>
    %84 = vector.shape_cast %83 : vector<1x4x4xf32> to vector<4x4xf32>
    %cst_46 = arith.constant dense<0.000000e+00> : vector<4x256xf32>
    %85 = tpu.matmul %84, %82, %cst_46 {dimension_numbers = #tpu.dot_dimension_numbers<[1], [0], [0], [1], [0, 0, 1, 1], [], []>} : vector<4x4xf32>, vector<4x256xf32>, vector<4x256xf32> -> vector<4x256xf32>
    %c239_i32 = arith.constant 239 : i32
    %86 = tpu.dynamic_rotate %1 by %c239_i32 dim 1 : vector<4x256xf32>, i32 -> vector<4x256xf32>
    %87 = vector.broadcast %40 : vector<1x256xf32> to vector<4x256xf32>
    %88 = arith.mulf %86, %87 : vector<4x256xf32>
    %c8 = arith.constant 8 : index
    %c0_47 = arith.constant 0 : index
    %c0_48 = arith.constant 0 : index
    %89 = vector.load %arg2[%c8, %c0_47, %c0_48] : memref<9x4x4xf32, #tpu.memory_space<vmem>>, vector<1x4x4xf32>
    %90 = vector.shape_cast %89 : vector<1x4x4xf32> to vector<4x4xf32>
    %cst_49 = arith.constant dense<0.000000e+00> : vector<4x256xf32>
    %91 = tpu.matmul %90, %88, %cst_49 {dimension_numbers = #tpu.dot_dimension_numbers<[1], [0], [0], [1], [0, 0, 1, 1], [], []>} : vector<4x4xf32>, vector<4x256xf32>, vector<4x256xf32> -> vector<4x256xf32>
    %92 = arith.addf %46, %52 : vector<4x256xf32>
    %93 = arith.addf %58, %64 : vector<4x256xf32>
    %94 = arith.addf %67, %73 : vector<4x256xf32>
    %95 = arith.addf %79, %85 : vector<4x256xf32>
    %96 = arith.addf %92, %93 : vector<4x256xf32>
    %97 = arith.addf %94, %95 : vector<4x256xf32>
    %98 = arith.addf %96, %97 : vector<4x256xf32>
    %99 = arith.addf %98, %91 : vector<4x256xf32>
    %c0_50 = arith.constant 0 : index
    %c0_51 = arith.constant 0 : index
    %c0_52 = arith.constant 0 : index
    %100 = vector.load %arg3[%c0_50, %c0_51, %c0_52] : memref<2x4x1xf32, #tpu.memory_space<vmem>>, vector<1x4x1xf32>
    %101 = vector.shape_cast %100 : vector<1x4x1xf32> to vector<4x1xf32>
    %102 = vector.broadcast %101 : vector<4x1xf32> to vector<4x256xf32>
    %103 = arith.mulf %99, %102 : vector<4x256xf32>
    %c1_53 = arith.constant 1 : index
    %c0_54 = arith.constant 0 : index
    %c0_55 = arith.constant 0 : index
    %104 = vector.load %arg3[%c1_53, %c0_54, %c0_55] : memref<2x4x1xf32, #tpu.memory_space<vmem>>, vector<1x4x1xf32>
    %105 = vector.shape_cast %104 : vector<1x4x1xf32> to vector<4x1xf32>
    %106 = vector.broadcast %105 : vector<4x1xf32> to vector<4x256xf32>
    %107 = arith.addf %103, %106 : vector<4x256xf32>
    %cst_56 = arith.constant 0.000000e+00 : f32
    %108 = vector.broadcast %cst_56 : f32 to vector<4x256xf32>
    %109 = arith.maximumf %107, %108 : vector<4x256xf32>
    %c17_i32_57 = arith.constant 17 : i32
    %110 = tpu.dynamic_rotate %109 by %c17_i32_57 dim 1 : vector<4x256xf32>, i32 -> vector<4x256xf32>
    %111 = vector.broadcast %16 : vector<1x256xf32> to vector<4x256xf32>
    %112 = arith.mulf %110, %111 : vector<4x256xf32>
    %c0_58 = arith.constant 0 : index
    %c0_59 = arith.constant 0 : index
    %c0_60 = arith.constant 0 : index
    %113 = vector.load %arg4[%c0_58, %c0_59, %c0_60] : memref<9x4x4xf32, #tpu.memory_space<vmem>>, vector<1x4x4xf32>
    %114 = vector.shape_cast %113 : vector<1x4x4xf32> to vector<4x4xf32>
    %cst_61 = arith.constant dense<0.000000e+00> : vector<4x256xf32>
    %115 = tpu.matmul %114, %112, %cst_61 {dimension_numbers = #tpu.dot_dimension_numbers<[1], [0], [0], [1], [0, 0, 1, 1], [], []>} : vector<4x4xf32>, vector<4x256xf32>, vector<4x256xf32> -> vector<4x256xf32>
    %c16_i32_62 = arith.constant 16 : i32
    %116 = tpu.dynamic_rotate %109 by %c16_i32_62 dim 1 : vector<4x256xf32>, i32 -> vector<4x256xf32>
    %117 = vector.broadcast %19 : vector<1x256xf32> to vector<4x256xf32>
    %118 = arith.mulf %116, %117 : vector<4x256xf32>
    %c1_63 = arith.constant 1 : index
    %c0_64 = arith.constant 0 : index
    %c0_65 = arith.constant 0 : index
    %119 = vector.load %arg4[%c1_63, %c0_64, %c0_65] : memref<9x4x4xf32, #tpu.memory_space<vmem>>, vector<1x4x4xf32>
    %120 = vector.shape_cast %119 : vector<1x4x4xf32> to vector<4x4xf32>
    %cst_66 = arith.constant dense<0.000000e+00> : vector<4x256xf32>
    %121 = tpu.matmul %120, %118, %cst_66 {dimension_numbers = #tpu.dot_dimension_numbers<[1], [0], [0], [1], [0, 0, 1, 1], [], []>} : vector<4x4xf32>, vector<4x256xf32>, vector<4x256xf32> -> vector<4x256xf32>
    %c15_i32_67 = arith.constant 15 : i32
    %122 = tpu.dynamic_rotate %109 by %c15_i32_67 dim 1 : vector<4x256xf32>, i32 -> vector<4x256xf32>
    %123 = vector.broadcast %23 : vector<1x256xf32> to vector<4x256xf32>
    %124 = arith.mulf %122, %123 : vector<4x256xf32>
    %c2_68 = arith.constant 2 : index
    %c0_69 = arith.constant 0 : index
    %c0_70 = arith.constant 0 : index
    %125 = vector.load %arg4[%c2_68, %c0_69, %c0_70] : memref<9x4x4xf32, #tpu.memory_space<vmem>>, vector<1x4x4xf32>
    %126 = vector.shape_cast %125 : vector<1x4x4xf32> to vector<4x4xf32>
    %cst_71 = arith.constant dense<0.000000e+00> : vector<4x256xf32>
    %127 = tpu.matmul %126, %124, %cst_71 {dimension_numbers = #tpu.dot_dimension_numbers<[1], [0], [0], [1], [0, 0, 1, 1], [], []>} : vector<4x4xf32>, vector<4x256xf32>, vector<4x256xf32> -> vector<4x256xf32>
    %c1_i32_72 = arith.constant 1 : i32
    %128 = tpu.dynamic_rotate %109 by %c1_i32_72 dim 1 : vector<4x256xf32>, i32 -> vector<4x256xf32>
    %129 = vector.broadcast %26 : vector<1x256xf32> to vector<4x256xf32>
    %130 = arith.mulf %128, %129 : vector<4x256xf32>
    %c3_73 = arith.constant 3 : index
    %c0_74 = arith.constant 0 : index
    %c0_75 = arith.constant 0 : index
    %131 = vector.load %arg4[%c3_73, %c0_74, %c0_75] : memref<9x4x4xf32, #tpu.memory_space<vmem>>, vector<1x4x4xf32>
    %132 = vector.shape_cast %131 : vector<1x4x4xf32> to vector<4x4xf32>
    %cst_76 = arith.constant dense<0.000000e+00> : vector<4x256xf32>
    %133 = tpu.matmul %132, %130, %cst_76 {dimension_numbers = #tpu.dot_dimension_numbers<[1], [0], [0], [1], [0, 0, 1, 1], [], []>} : vector<4x4xf32>, vector<4x256xf32>, vector<4x256xf32> -> vector<4x256xf32>
    %c4_77 = arith.constant 4 : index
    %c0_78 = arith.constant 0 : index
    %c0_79 = arith.constant 0 : index
    %134 = vector.load %arg4[%c4_77, %c0_78, %c0_79] : memref<9x4x4xf32, #tpu.memory_space<vmem>>, vector<1x4x4xf32>
    %135 = vector.shape_cast %134 : vector<1x4x4xf32> to vector<4x4xf32>
    %cst_80 = arith.constant dense<0.000000e+00> : vector<4x256xf32>
    %136 = tpu.matmul %135, %109, %cst_80 {dimension_numbers = #tpu.dot_dimension_numbers<[1], [0], [0], [1], [0, 0, 1, 1], [], []>} : vector<4x4xf32>, vector<4x256xf32>, vector<4x256xf32> -> vector<4x256xf32>
    %c255_i32_81 = arith.constant 255 : i32
    %137 = tpu.dynamic_rotate %109 by %c255_i32_81 dim 1 : vector<4x256xf32>, i32 -> vector<4x256xf32>
    %138 = vector.broadcast %29 : vector<1x256xf32> to vector<4x256xf32>
    %139 = arith.mulf %137, %138 : vector<4x256xf32>
    %c5_82 = arith.constant 5 : index
    %c0_83 = arith.constant 0 : index
    %c0_84 = arith.constant 0 : index
    %140 = vector.load %arg4[%c5_82, %c0_83, %c0_84] : memref<9x4x4xf32, #tpu.memory_space<vmem>>, vector<1x4x4xf32>
    %141 = vector.shape_cast %140 : vector<1x4x4xf32> to vector<4x4xf32>
    %cst_85 = arith.constant dense<0.000000e+00> : vector<4x256xf32>
    %142 = tpu.matmul %141, %139, %cst_85 {dimension_numbers = #tpu.dot_dimension_numbers<[1], [0], [0], [1], [0, 0, 1, 1], [], []>} : vector<4x4xf32>, vector<4x256xf32>, vector<4x256xf32> -> vector<4x256xf32>
    %c241_i32_86 = arith.constant 241 : i32
    %143 = tpu.dynamic_rotate %109 by %c241_i32_86 dim 1 : vector<4x256xf32>, i32 -> vector<4x256xf32>
    %144 = vector.broadcast %33 : vector<1x256xf32> to vector<4x256xf32>
    %145 = arith.mulf %143, %144 : vector<4x256xf32>
    %c6_87 = arith.constant 6 : index
    %c0_88 = arith.constant 0 : index
    %c0_89 = arith.constant 0 : index
    %146 = vector.load %arg4[%c6_87, %c0_88, %c0_89] : memref<9x4x4xf32, #tpu.memory_space<vmem>>, vector<1x4x4xf32>
    %147 = vector.shape_cast %146 : vector<1x4x4xf32> to vector<4x4xf32>
    %cst_90 = arith.constant dense<0.000000e+00> : vector<4x256xf32>
    %148 = tpu.matmul %147, %145, %cst_90 {dimension_numbers = #tpu.dot_dimension_numbers<[1], [0], [0], [1], [0, 0, 1, 1], [], []>} : vector<4x4xf32>, vector<4x256xf32>, vector<4x256xf32> -> vector<4x256xf32>
    %c240_i32_91 = arith.constant 240 : i32
    %149 = tpu.dynamic_rotate %109 by %c240_i32_91 dim 1 : vector<4x256xf32>, i32 -> vector<4x256xf32>
    %150 = vector.broadcast %36 : vector<1x256xf32> to vector<4x256xf32>
    %151 = arith.mulf %149, %150 : vector<4x256xf32>
    %c7_92 = arith.constant 7 : index
    %c0_93 = arith.constant 0 : index
    %c0_94 = arith.constant 0 : index
    %152 = vector.load %arg4[%c7_92, %c0_93, %c0_94] : memref<9x4x4xf32, #tpu.memory_space<vmem>>, vector<1x4x4xf32>
    %153 = vector.shape_cast %152 : vector<1x4x4xf32> to vector<4x4xf32>
    %cst_95 = arith.constant dense<0.000000e+00> : vector<4x256xf32>
    %154 = tpu.matmul %153, %151, %cst_95 {dimension_numbers = #tpu.dot_dimension_numbers<[1], [0], [0], [1], [0, 0, 1, 1], [], []>} : vector<4x4xf32>, vector<4x256xf32>, vector<4x256xf32> -> vector<4x256xf32>
    %c239_i32_96 = arith.constant 239 : i32
    %155 = tpu.dynamic_rotate %109 by %c239_i32_96 dim 1 : vector<4x256xf32>, i32 -> vector<4x256xf32>
    %156 = vector.broadcast %40 : vector<1x256xf32> to vector<4x256xf32>
    %157 = arith.mulf %155, %156 : vector<4x256xf32>
    %c8_97 = arith.constant 8 : index
    %c0_98 = arith.constant 0 : index
    %c0_99 = arith.constant 0 : index
    %158 = vector.load %arg4[%c8_97, %c0_98, %c0_99] : memref<9x4x4xf32, #tpu.memory_space<vmem>>, vector<1x4x4xf32>
    %159 = vector.shape_cast %158 : vector<1x4x4xf32> to vector<4x4xf32>
    %cst_100 = arith.constant dense<0.000000e+00> : vector<4x256xf32>
    %160 = tpu.matmul %159, %157, %cst_100 {dimension_numbers = #tpu.dot_dimension_numbers<[1], [0], [0], [1], [0, 0, 1, 1], [], []>} : vector<4x4xf32>, vector<4x256xf32>, vector<4x256xf32> -> vector<4x256xf32>
    %161 = arith.addf %115, %121 : vector<4x256xf32>
    %162 = arith.addf %127, %133 : vector<4x256xf32>
    %163 = arith.addf %136, %142 : vector<4x256xf32>
    %164 = arith.addf %148, %154 : vector<4x256xf32>
    %165 = arith.addf %161, %162 : vector<4x256xf32>
    %166 = arith.addf %163, %164 : vector<4x256xf32>
    %167 = arith.addf %165, %166 : vector<4x256xf32>
    %168 = arith.addf %167, %160 : vector<4x256xf32>
    %c0_101 = arith.constant 0 : index
    %c0_102 = arith.constant 0 : index
    %c0_103 = arith.constant 0 : index
    %169 = vector.load %arg5[%c0_101, %c0_102, %c0_103] : memref<2x4x1xf32, #tpu.memory_space<vmem>>, vector<1x4x1xf32>
    %170 = vector.shape_cast %169 : vector<1x4x1xf32> to vector<4x1xf32>
    %171 = vector.broadcast %170 : vector<4x1xf32> to vector<4x256xf32>
    %172 = arith.mulf %168, %171 : vector<4x256xf32>
    %c1_104 = arith.constant 1 : index
    %c0_105 = arith.constant 0 : index
    %c0_106 = arith.constant 0 : index
    %173 = vector.load %arg5[%c1_104, %c0_105, %c0_106] : memref<2x4x1xf32, #tpu.memory_space<vmem>>, vector<1x4x1xf32>
    %174 = vector.shape_cast %173 : vector<1x4x1xf32> to vector<4x1xf32>
    %175 = vector.broadcast %174 : vector<4x1xf32> to vector<4x256xf32>
    %176 = arith.addf %172, %175 : vector<4x256xf32>
    %177 = arith.addf %176, %1 : vector<4x256xf32>
    %cst_107 = arith.constant 0.000000e+00 : f32
    %178 = vector.broadcast %cst_107 : f32 to vector<4x256xf32>
    %179 = arith.maximumf %177, %178 : vector<4x256xf32>
    %c0_108 = arith.constant 0 : index
    %c0_109 = arith.constant 0 : index
    %c0_110 = arith.constant 0 : index
    %180 = vector.load %arg6[%c0_108, %c0_109, %c0_110] : memref<1x4x256xf32, #tpu.memory_space<vmem>>, vector<1x4x256xf32>
    %181 = vector.shape_cast %180 : vector<1x4x256xf32> to vector<4x256xf32>
    %182 = vector.shape_cast %179 : vector<4x256xf32> to vector<1x4x256xf32>
    tpu.vector_store %arg6[%c0_108, %c0_109, %c0_110], %182 {strides = array<i32>} : memref<1x4x256xf32, #tpu.memory_space<vmem>>, vector<1x4x256xf32>,
    return
  }
  func.func @transform_0(%arg0: i32) -> (i32, i32, i32) {
    %c0_i32 = arith.constant 0 : i32
    %c0_i32_0 = arith.constant 0 : i32
    %c0_i32_1 = arith.constant 0 : i32
    return %arg0, %c0_i32, %c0_i32_0 : i32, i32, i32
  }
  func.func @transform_1(%arg0: i32) -> (i32, i32, i32) {
    %c0_i32 = arith.constant 0 : i32
    %c0_i32_0 = arith.constant 0 : i32
    %c0_i32_1 = arith.constant 0 : i32
    %c0_i32_2 = arith.constant 0 : i32
    return %c0_i32, %c0_i32_0, %c0_i32_1 : i32, i32, i32
  }
  func.func @transform_2(%arg0: i32) -> (i32, i32, i32) {
    %c0_i32 = arith.constant 0 : i32
    %c0_i32_0 = arith.constant 0 : i32
    %c0_i32_1 = arith.constant 0 : i32
    %c0_i32_2 = arith.constant 0 : i32
    return %c0_i32, %c0_i32_0, %c0_i32_1 : i32, i32, i32
  }
  func.func @transform_3(%arg0: i32) -> (i32, i32, i32) {
    %c0_i32 = arith.constant 0 : i32
    %c0_i32_0 = arith.constant 0 : i32
    %c0_i32_1 = arith.constant 0 : i32
    %c0_i32_2 = arith.constant 0 : i32
    return %c0_i32, %c0_i32_0, %c0_i32_1 : i32, i32, i32
  }
  func.func @transform_4(%arg0: i32) -> (i32, i32, i32) {
    %c0_i32 = arith.constant 0 : i32
    %c0_i32_0 = arith.constant 0 : i32
    %c0_i32_1 = arith.constant 0 : i32
    %c0_i32_2 = arith.constant 0 : i32
    return %c0_i32, %c0_i32_0, %c0_i32_1 : i32, i32, i32
  }
  func.func @transform_5(%arg0: i32) -> (i32, i32, i32) {
    %c0_i32 = arith.constant 0 : i32
    %c0_i32_0 = arith.constant 0 : i32
    %c0_i32_1 = arith.constant 0 : i32
    return %arg0, %c0_i32, %c0_i32_0 : i32, i32, i32
  }
}

</mosaic_0001>

<bundles_post_ra>
// kernel: tpu_custom_call.1
= control target key start
LH: loop header
LB: loop body
LE: loop exit
PB: predicated region body
PF: predicated region fallthrough
CT: control target
= control target key end

     0   :  { %10 = vsyncpa [#allocation3], 0  ;;  %s2233_s0 = inlined_call_operand.vmem [shape: f32[2,4,256], index: 0, kind: input, shape index: {}]   ;;  %s2234_s1 = inlined_call_operand.vmem [shape: f32[9,4,4], index: 1, kind: input, shape index: {}]   ;;  %s2235_s2 = inlined_call_operand.vmem [shape: f32[2,4,1], index: 2, kind: input, shape index: {}]   ;;  %s2236_s3 = inlined_call_operand.vmem [shape: f32[9,4,4], index: 3, kind: input, shape index: {}]   ;;  %s2237_s4 = inlined_call_operand.vmem [shape: f32[2,4,1], index: 4, kind: input, shape index: {}]   ;;  %s2238_s5 = inlined_call_operand.hbm [shape: f32[2,4,256], index: 5, kind: output, shape index: {}]  }
   0x1   :  { %12 = vsyncpa [#allocation3 + $0x1], 0  ;;  %s1760_s18 = smov 0   ;;  %s1762_s19 = smov 0  }
   0x2   :  { %s1764_s20 = smov 0   ;;  %s1766_s21 = smov 0  }
   0x3 LB: > { %s1781_s22 = sadd.s32 4294967295, %s1718_s21   ;;  %s1500_s23 = sadd.s32 4294967294, %s1718_s21   ;;  %s1718_s21 = sphi %s1766_s21, %s2252_s21   ;;  %s1714_s20 = sphi %s1764_s20, %s2251_s20   ;;  %s1710_s19 = sphi %s1762_s19, %s2250_s19   ;;  %s1706_s18 = sphi %s1760_s18, %s2249_s18  }
   0x4   : > { %s1785_s24 = sadd.s32 1, %s1718_s21   ;;  %s135_s25 = sadd.s32 1, %s1714_s20 }
   0x5   : > { %s132_s26 = ssub.s32 %s1718_s21, %s1785_s24  ;;  %p145_p0 = scmp.ne.s32.totalorder %s1714_s20, %s1710_s19 }
   0x6   : > { %p133_p1 = scmp.eq.s32.totalorder %s132_s26, 0  ;;  %p146_p2 = scmp.eq.s32.totalorder %s1781_s22, 1 }
   0x7   : > { %p151_p3 = scmp.ne.s32.totalorder %s1710_s19, %s1706_s18  ;;  %p152_p4 = scmp.eq.s32.totalorder %s1500_s23, 1 }
   0x8   : > { %s1796_s27 = scalar_select %p133_p1, %s1714_s20, %s135_s25  }
   0x9   : > { %p1798_p5 = por %p146_p2, %p145_p0  ;;  %p1802_p6 = por %p152_p4, %p151_p3 }
   0xa   : > { %p1503_p7 = scmp.ge.s32.totalorder %s1718_s21, 1  ;;  %p190_p8 = scmp.lt.s32.totalorder %s1718_s21, 3 }
   0xc   : > { %p191_p9 = pnand %p1503_p7, %p190_p8 }
   0xd   : > { %p218_p10 = scmp.lt.s32.totalorder (!%p191_p9), %s1781_s22, 1  ;;  %s1720_s10 = smov (!%p191_p9), 16  }
   0xe   : > { %194 = sbr.rel (%p191_p9) target bundleno = 679 (0x2a7), region = 40  ;;  %s1721_s11 = smov (!%p191_p9), 1  }
   0xf   : > { %s1722_s12 = smov (!%p191_p9), 127   ;;  %s1723_s13 = smov (!%p191_p9), 112  }
  0x10   : > { %s1724_s14 = smov (!%p191_p9), 17   ;;  %s1725_s15 = smov (!%p191_p9), 111  }
  0x11   : > { %s1726_s16 = smov (!%p191_p9), 15   ;;  %s1727_s17 = smov (!%p191_p9), 113  }
  0x12   : > { %s1603_s8 = sshll.u32 (!%p191_p9), %s1781_s22, 3 }
  0x13   : > { %s219_s30 = scalar_select %p218_p10, %s1781_s22, 1  ;;  %v224_v17 = vlaneseq  ;;  %vm297_vm5 = vcmask 1043456   ;;  %v1728_v26 = vmov 0.0   ;;  %v1507_v32 = vld [vmem:[%s2234_s1 + $0x4] sm:$0xf]  ;;  %vm293_vm6 = vcmask 31744  }
  0x14   : > { %v1519_v41 = vld [vmem:[%s2234_s1 + $0x14] sm:$0xf]  ;;  %v1513_v51 = vld [vmem:[%s2234_s1 + $0xc] sm:$0xf]  ;;  %v843_v55 = vld [vmem:[%s2235_s2] sm:$0xf]  ;;  %s1436_s25 = scalar_lea.hbm %s2238_s5, %s1603_s8 }
  0x15   : > { %s1602_s6 = sshll.u32 %s219_s30, 3  ;;  %v1840_v18 = vand.u32 127, %v224_v17  ;;  %v1551_v56 = vld [vmem:[%s2235_s2 + $0x4] sm:$0xf]  ;;  %v1729_v58 = vmov 0  }
  0x16   : > { %s222_s9 = scalar_lea.vmem %s2233_s0, %s1602_s6  ;;  %1653 = vset.pattern.permute.xlu1 %v1729_v58  ;;  %1654 = vset.pattern.permute.xlu2 %v1729_v58  ;;  %v1525_v61 = vld [vmem:[%s2234_s1 + $0x1c] sm:$0xf]  ;;  %v1512_v25 = vld [vmem:[%s2234_s1 + $0x8] sm:$0xf]  ;;  %s1440_s6 = sshll.u32 %s1436_s25, 4  ;;  %s1441_s6 = int_to_ptr.hbm [resolvable:$true] %s1440_s6 }
  0x17   : > { %v1813_v0 = vld [vmem:[%s222_s9] sm:$0xff]  ;;  %v1843_v19 = vadd.s32 128, %v1840_v18  ;;  %v227_v22 = vand.u32 15, %v1840_v18  ;;  %vm229_vm2 = vcmp.ge.s32.totalorder %v1840_v18, 16  ;;  %vm286_vm3 = vcmp.lt.s32.totalorder %v1840_v18, 16  ;;  %1655 = vset.pattern.permute.xlu0 %v1729_v58  ;;  %s1670_s7 = sshra.s32 %s1441_s6, 4  ;;  %s1671_s7 = int_to_ptr.hbm [resolvable:$true] %s1670_s7 }
  0x18   : > { %262 = vst [vmem:[#allocation1] ss:$2 sm:$0xff] %v1813_v0  ;;  %vm436_vm4 = vcmp.lt.s32.totalorder %v1840_v18, 127  ;;  %v1871_v29 = vsel %vm229_vm2, 1.0, %v1728_v26  ;;  %vm369_vm9 = vcmp.lt.s32.totalorder %v1840_v18, 1  ;;  %vm517_vm11 = vcmp.lt.s32.totalorder %v1840_v18, 112  ;;  %p1677_p0 = scmp.lt.s32.totalorder %s1671_s7, %s2238_s5 }
  0x19   : > { %v228_v23 = vand.u32 15, %v1843_v19  ;;  %vm1847_vm0 = vcmp.lt.s32.totalorder %v227_v22, 15  ;;  %vm1897_vm7 = vcmp.ge.s32.totalorder %v227_v22, 1  ;;  %vm232_vm10 = vcmp.lt.s32.totalorder %v1843_v19, 240 }
  0x1a   : > { %v1866_v28 = vsel %vm1847_vm0, 1.0, %v1728_v26  ;;  %v1910_v44 = vsel %vm1897_vm7, 1.0, %v1728_v26  ;;  %v1942_v57 = vsel %vm232_vm10, 1.0, %v1728_v26  ;;  %vm237_vm13 = vmand %vm229_vm2, %vm1897_vm7  ;;  %vm582_vm14 = vcmp.lt.s32.totalorder %v1840_v18, 111 }
  0x1b   : > { %vm1851_vm1 = vcmp.lt.s32.totalorder %v228_v23, 15  ;;  %vm1901_vm8 = vcmp.ge.s32.totalorder %v228_v23, 1  ;;  %vm271_vm15 = vcmp.lt.s32.totalorder %v1840_v18, 17  ;;  %vm353_vm7 = vcmp.lt.s32.totalorder %v1840_v18, 15 }
  0x1c   : > { %v1861_v27 = vsel %vm1851_vm1, 1.0, %v1728_v26  ;;  %v1915_v45 = vsel %vm1901_vm8, 1.0, %v1728_v26  ;;  %vm258_vm12 = vmand %vm232_vm10, %vm1851_vm1 }
  0x1d   : > { %vm243_vm1 = vmand %vm229_vm2, %vm1847_vm0  ;;  %vm501_vm2 = vcmp.lt.s32.totalorder %v1840_v18, 113 }
  0x1e   : > { %vm252_vm0 = vmand %vm232_vm10, %vm1901_vm8 }
  0x1f   : > { %v263_v1 = vld.sshfl [vmem:[#allocation1] sm:$0xff pattern:$0x75316420]  ;;  %v264_v2 = vld.sshfl [vmem:[#allocation1 + $0x8] sm:$0xff pattern:$0x75316420] }
  0x20   : > { %277 = vst [vmem:[#allocation1] ss:$2 sm:$0xff] %v1813_v0 }
  0x27   : > { %v278_v3 = vld.sshfl [vmem:[#allocation1] sm:$0xff pattern:$0x75316420]  ;;  %v279_v4 = vld.sshfl [vmem:[#allocation1 + $0x8] sm:$0xff pattern:$0x75316420] }
  0x28   : > { %282 = vrot.lane.b32.xlu0 %v278_v3, %s1720_s10  ;;  %344 = vst [vmem:[#allocation1] ss:$2 sm:$0xff] %v1813_v0  ;;  %v1970_v3 = vsel %vm237_vm13, 1.0, %v1728_v26 }
  0x2f   : > { %v345_v5 = vld.sshfl [vmem:[#allocation1] sm:$0xff pattern:$0x75316420]  ;;  %v346_v6 = vld.sshfl [vmem:[#allocation1 + $0x8] sm:$0xff pattern:$0x75316420] }
  0x30   : > { %360 = vst [vmem:[#allocation1] ss:$2 sm:$0xff] %v1813_v0  ;;  %284 = vrot.lane.b32.xlu0 %v279_v4, %s1720_s10 }
  0x37   : > { %v361_v7 = vld.sshfl [vmem:[#allocation1] sm:$0xff pattern:$0x75316420]  ;;  %v362_v8 = vld.sshfl [vmem:[#allocation1 + $0x8] sm:$0xff pattern:$0x75316420] }
  0x38   : > { %365 = vrot.lane.b32.xlu1 %v361_v7, %s1721_s11  ;;  %427 = vst [vmem:[#allocation1] ss:$2 sm:$0xff] %v1813_v0 }
  0x3f   : > { %v428_v9 = vld.sshfl [vmem:[#allocation1] sm:$0xff pattern:$0x75316420]  ;;  %v429_v10 = vld.sshfl [vmem:[#allocation1 + $0x8] sm:$0xff pattern:$0x75316420] }
  0x40   : > { %367 = vrot.lane.b32.xlu1 %v362_v8, %s1721_s11  ;;  %492 = vst [vmem:[#allocation1] ss:$2 sm:$0xff] %v1813_v0  ;;  %432 = vrot.lane.b32.xlu2 %v428_v9, %s1722_s12 }
  0x47   : > { %v493_v11 = vld.sshfl [vmem:[#allocation1] sm:$0xff pattern:$0x75316420]  ;;  %v494_v12 = vld.sshfl [vmem:[#allocation1 + $0x8] sm:$0xff pattern:$0x75316420] }
  0x48   : > { %508 = vst [vmem:[#allocation1] ss:$2 sm:$0xff] %v1813_v0  ;;  %434 = vrot.lane.b32.xlu2 %v429_v10, %s1722_s12 }
  0x4f   : > { %v510_v13 = vld.sshfl [vmem:[#allocation1 + $0x8] sm:$0xff pattern:$0x75316420]  ;;  %v509_v14 = vld.sshfl [vmem:[#allocation1] sm:$0xff pattern:$0x75316420] }
  0x50   : > { %515 = vrot.lane.b32.xlu1 %v510_v13, %s1723_s13  ;;  %513 = vrot.lane.b32.xlu0 %v509_v14, %s1723_s13  ;;  %573 = vst [vmem:[#allocation1] ss:$2 sm:$0xff] %v1813_v0  ;;  %v1530_v14 = vld [vmem:[%s2234_s1 + $0x20] sm:$0xf] }
  0x57   : > { %v575_v15 = vld.sshfl [vmem:[#allocation1 + $0x8] sm:$0xff pattern:$0x75316420]  ;;  %v574_v16 = vld.sshfl [vmem:[#allocation1] sm:$0xff pattern:$0x75316420] }
  0x58   : > { %267 = vrot.lane.b32.xlu1 %v263_v1, %s1724_s14  ;;  %580 = vrot.lane.b32.xlu0 %v575_v15, %s1725_s15  ;;  %736 = vst [vmem:[#allocation1] ss:$2 sm:$0xff] %v1813_v0  ;;  %v276_v15 = vld [vmem:[%s2234_s1] sm:$0xf] }
  0x59   : > { %578 = vrot.lane.b32.xlu2 %v574_v16, %s1725_s15  ;;  %v2004_v16 = vsel %vm243_vm1, 1.0, %v1728_v26 }
  0x5f   : > { %v737_v52 = vld.sshfl [vmem:[#allocation1] sm:$0xff pattern:$0x75316420]  ;;  %v738_v53 = vld.sshfl [vmem:[#allocation1 + $0x8] sm:$0xff pattern:$0x75316420] }
  0x60   : > { %351 = vrot.lane.b32.xlu1 %v346_v6, %s1726_s16  ;;  %349 = vrot.lane.b32.xlu0 %v345_v5, %s1726_s16  ;;  %1409 = vst [vmem:[#allocation1] ss:$2 sm:$0xff] %v1813_v0 }
  0x61   : > { %269 = vrot.lane.b32.xlu2 %v264_v2, %s1724_s14  ;;  %v1967_v2 = vsel %vm258_vm12, 1.0, %v1728_v26 }
  0x68   : > { %499 = vrot.lane.b32.xlu0 %v494_v12, %s1727_s17  ;;  %846 = vperm.xlu1 %1653, %v843_v55  }
  0x69   : > { %497 = vrot.lane.b32.xlu2 %v493_v11, %s1727_s17 }
  0x71   : > { %855 = vperm.xlu2 %1654, %v1551_v56  }
  0x9a   : > { %v283_v20 = vpop.permute.xlu0 %282  ;;  %v433_v21 = vpop.permute.xlu2 %432 }
  0xa2   : > { %v285_v30 = vpop.permute.xlu0 %284  ;;  %v435_v31 = vpop.permute.xlu2 %434 }
  0xa3   : > { %v288_v33 = vsel %vm286_vm3, %v285_v30, %v283_v20  ;;  %v287_v34 = vsel %vm286_vm3, %v283_v20, %v285_v30  ;;  %v437_v35 = vsel %vm436_vm4, %v433_v21, %v435_v31  ;;  %v438_v36 = vsel %vm436_vm4, %v435_v31, %v433_v21  ;;  %v1518_v30 = vld [vmem:[%s2234_s1 + $0x10] sm:$0xf] }
  0xa4   : > { %1510 = vmatpush.msk.msra.mxu1 %vm297_vm5, %v287_v34  ;;  %v439_v37 = vmul.f32 %v437_v35, %v1866_v28  ;;  %v440_v38 = vmul.f32 %v438_v36, %v1861_v27  ;;  %v289_v39 = vmul.f32 %v288_v33, %v1871_v29 }
  0xa5   : > { %1511 = vmatmul.msk.f32.vlgmr.msra.gmra.mxu1 %vm293_vm6, %v1507_v32 }
  0xa6   : > { %1508 = vmatpush.msk.msra.mxu0 %vm297_vm5, %v289_v39  ;;  %1522 = vmatpush.msk.msrb.mxu1 %vm297_vm5, %v440_v38 }
  0xa7   : > { %1509 = vmatmul.msk.f32.vlgmr.msra.gmra.mxu0 %vm293_vm6, %v1507_v32  ;;  %v2032_v32 = vsel %vm252_vm0, 1.0, %v1728_v26 }
  0xa8   : > { %1520 = vmatpush.msk.msrb.mxu0 %vm297_vm5, %v439_v37  ;;  %v1524_v37 = vld [vmem:[%s2234_s1 + $0x18] sm:$0xf] }
  0xaa   : > { %v366_v40 = vpop.permute.xlu1 %365 }
  0xad   : > { %1523 = vmatmul.msk.f32.vlgmr.msrb.gmra.mxu1 %vm293_vm6, %v1519_v41 }
  0xaf   : > { %1521 = vmatmul.msk.f32.vlgmr.msrb.gmra.mxu0 %vm293_vm6, %v1519_v41 }
  0xb2   : > { %v368_v46 = vpop.permute.xlu1 %367 }
  0xb3   : > { %v370_v47 = vsel %vm369_vm9, %v366_v40, %v368_v46  ;;  %v371_v48 = vsel %vm369_vm9, %v368_v46, %v366_v40  ;;  %v579_v54 = vpop.permute.xlu2 %578 }
  0xb4   : > { %v372_v49 = vmul.f32 %v371_v48, %v1910_v44  ;;  %v373_v50 = vmul.f32 %v370_v47, %v1915_v45 }
  0xb6   : > { %1514 = vmatpush.msk.msra.mxu2 %vm297_vm5, %v372_v49  ;;  %1516 = vmatpush.msk.msra.mxu3 %vm297_vm5, %v373_v50 }
  0xb7   : > { %1515 = vmatmul.msk.f32.vlgmr.msra.gmra.mxu2 %vm293_vm6, %v1513_v51  ;;  %1517 = vmatmul.msk.f32.vlgmr.msra.gmra.mxu3 %vm293_vm6, %v1513_v51 }
  0xbb   : > { %v270_v1 = vpop.permute.xlu2 %269 }
  0xc2   : > { %v516_v59 = vpop.permute.xlu1 %515  ;;  %v514_v60 = vpop.permute.xlu0 %513 }
  0xc3   : > { %v519_v62 = vsel %vm517_vm11, %v516_v59, %v514_v60  ;;  %v518_v63 = vsel %vm517_vm11, %v514_v60, %v516_v59  ;;  %v498_v31 = vpop.permute.xlu2 %497 }
  0xc4   : > { %v521_v0 = vmul.f32 %v519_v62, %v1942_v57  ;;  %1526 = vmatpush.msk.msrb.mxu2 %vm297_vm5, %v518_v63 }
  0xc5   : > { %1527 = vmatmul.msk.f32.vlgmr.msrb.gmra.mxu2 %vm293_vm6, %v1525_v61 }
  0xc6   : > { %1528 = vmatpush.msk.msrb.mxu3 %vm297_vm5, %v521_v0 }
  0xc7   : > { %1529 = vmatmul.msk.f32.vlgmr.msrb.gmra.mxu3 %vm293_vm6, %v1525_v61 }
  0xca   : > { %v268_v4 = vpop.permute.xlu1 %267  ;;  %v581_v5 = vpop.permute.xlu0 %580 }
  0xcb   : > { %v583_v6 = vsel %vm582_vm14, %v579_v54, %v581_v5  ;;  %v584_v7 = vsel %vm582_vm14, %v581_v5, %v579_v54  ;;  %v272_v8 = vsel %vm271_vm15, %v268_v4, %v270_v1  ;;  %v273_v9 = vsel %vm271_vm15, %v270_v1, %v268_v4 }
  0xcc   : > { %v585_v10 = vmul.f32 %v583_v6, %v1866_v28  ;;  %v586_v11 = vmul.f32 %v584_v7, %v1967_v2  ;;  %v274_v12 = vmul.f32 %v273_v9, %v1970_v3  ;;  %v275_v13 = vmul.f32 %v272_v8, %v1915_v45 }
  0xce   : > { %1531 = vmatpush.msk.msra.mxu0 %vm297_vm5, %v585_v10  ;;  %1533 = vmatpush.msk.msra.mxu1 %vm297_vm5, %v586_v11 }
  0xcf   : > { %1535 = vmatpush.msk.msra.mxu2 %vm297_vm5, %v274_v12  ;;  %1537 = vmatpush.msk.msra.mxu3 %vm297_vm5, %v275_v13  ;;  %v856_v13 = vpop.permute.xlu2 %855 }
  0xd0   : > { %1532 = vmatmul.msk.f32.vlgmr.msra.gmra.mxu0 %vm293_vm6, %v1530_v14  ;;  %1534 = vmatmul.msk.f32.vlgmr.msra.gmra.mxu1 %vm293_vm6, %v1530_v14 }
  0xd1   : > { %1536 = vmatmul.msk.f32.vlgmr.msra.gmra.mxu2 %vm293_vm6, %v276_v15  ;;  %1538 = vmatmul.msk.f32.vlgmr.msra.gmra.mxu3 %vm293_vm6, %v276_v15 }
  0xd2   : > { %v352_v17 = vpop.permute.xlu1 %351  ;;  %v350_v20 = vpop.permute.xlu0 %349  ;;  %1543 = vmatpush.msk.msrb.mxu2 %vm297_vm5, %v737_v52  ;;  %1545 = vmatpush.msk.msrb.mxu3 %vm297_vm5, %v738_v53 }
  0xd3   : > { %v354_v21 = vsel %vm353_vm7, %v350_v20, %v352_v17  ;;  %v355_v22 = vsel %vm353_vm7, %v352_v17, %v350_v20 }
  0xd4   : > { %v356_v23 = vmul.f32 %v355_v22, %v2004_v16  ;;  %v357_v24 = vmul.f32 %v354_v21, %v1861_v27 }
  0xd6   : > { %1539 = vmatpush.msk.msrb.mxu0 %vm297_vm5, %v356_v23  ;;  %1541 = vmatpush.msk.msrb.mxu1 %vm297_vm5, %v357_v24  ;;  %v1392_v23 = vld [vmem:[%s2237_s4] sm:$0xf]  ;;  %v1596_v24 = vld [vmem:[%s2237_s4 + $0x4] sm:$0xf] }
  0xd8   : > { %1540 = vmatmul.msk.f32.vlgmr.msrb.gmra.mxu0 %vm293_vm6, %v1512_v25  ;;  %1542 = vmatmul.msk.f32.vlgmr.msrb.gmra.mxu1 %vm293_vm6, %v1512_v25 }
  0xd9   : > { %1544 = vmatmul.msk.f32.vlgmr.msrb.gmra.mxu2 %vm293_vm6, %v1518_v30  ;;  %1546 = vmatmul.msk.f32.vlgmr.msrb.gmra.mxu3 %vm293_vm6, %v1518_v30 }
  0xda   : > { %v500_v33 = vpop.permute.xlu0 %499  ;;  %v847_v10 = vpop.permute.xlu1 %846 }
  0xdb   : > { %v502_v34 = vsel %vm501_vm2, %v498_v31, %v500_v33  ;;  %v503_v19 = vsel %vm501_vm2, %v500_v33, %v498_v31  ;;  %v1552_v33 = vld [vmem:[%s2236_s3 + $0x4] sm:$0xf] }
  0xdc   : > { %v504_v35 = vmul.f32 %v502_v34, %v1910_v44  ;;  %v505_v36 = vmul.f32 %v503_v19, %v2032_v32 }
  0xde   : > { %1547 = vmatpush.msk.msra.mxu0 %vm297_vm5, %v504_v35  ;;  %1549 = vmatpush.msk.msra.mxu1 %vm297_vm5, %v505_v36 }
  0xe0   : > { %1548 = vmatmul.msk.f32.vlgmr.msra.gmra.mxu0 %vm293_vm6, %v1524_v37  ;;  %1550 = vmatmul.msk.f32.vlgmr.msra.gmra.mxu1 %vm293_vm6, %v1524_v37 }
 0x122   : > { %v341_v38 = vpop.f32.mrf.mxu1 }
 0x124   : > { %v321_v26 = vpop.f32.mrf.mxu0 }
 0x12a   : > { %v489_v42 = vpop.f32.mrf.mxu1 }
 0x12c   : > { %v469_v41 = vpop.f32.mrf.mxu0 }
 0x13a   : > { %v402_v39 = vpop.f32.mrf.mxu2  ;;  %v422_v40 = vpop.f32.mrf.mxu3 }
 0x148   : > { %v550_v43 = vpop.f32.mrf.mxu2 }
 0x14a   : > { %v570_v46 = vpop.f32.mrf.mxu3 }
 0x14d   : > { %v615_v47 = vpop.f32.mrf.mxu0  ;;  %v635_v48 = vpop.f32.mrf.mxu1 }
 0x154   : > { %v664_v49 = vpop.f32.mrf.mxu2  ;;  %v684_v50 = vpop.f32.mrf.mxu3 }
 0x155   : > { %v713_v51 = vpop.f32.mrf.mxu0  ;;  %v733_v52 = vpop.f32.mrf.mxu1  ;;  %v665_v58 = vadd.f32 %v664_v49, %v321_v26  ;;  %v685_v59 = vadd.f32 %v684_v50, %v341_v38 }
 0x156   : > { %v714_v53 = vadd.f32 %v713_v51, %v402_v39  ;;  %v734_v54 = vadd.f32 %v733_v52, %v422_v40 }
 0x158   : > { %v835_v4 = vadd.f32 %v714_v53, %v665_v58  ;;  %v836_v5 = vadd.f32 %v734_v54, %v685_v59 }
 0x15c   : > { %v763_v55 = vpop.f32.mrf.mxu2  ;;  %v783_v56 = vpop.f32.mrf.mxu3 }
 0x15d   : > { %v812_v60 = vpop.f32.mrf.mxu0  ;;  %v832_v61 = vpop.f32.mrf.mxu1  ;;  %v764_v62 = vadd.f32 %v763_v55, %v469_v41  ;;  %v784_v63 = vadd.f32 %v783_v56, %v489_v42  ;;  %v1575_v56 = vld [vmem:[%s2236_s3 + $0x20] sm:$0xf] }
 0x15e   : > { %v813_v0 = vadd.f32 %v812_v60, %v550_v43  ;;  %v833_v1 = vadd.f32 %v832_v61, %v570_v46 }
 0x160   : > { %v837_v6 = vadd.f32 %v813_v0, %v764_v62  ;;  %v838_v7 = vadd.f32 %v833_v1, %v784_v63  ;;  %v1570_v1 = vld [vmem:[%s2236_s3 + $0x1c] sm:$0xf] }
 0x162   : > { %v839_v8 = vadd.f32 %v837_v6, %v835_v4  ;;  %v840_v9 = vadd.f32 %v838_v7, %v836_v5 }
 0x164   : > { %v841_v11 = vadd.f32 %v839_v8, %v615_v47  ;;  %v842_v12 = vadd.f32 %v840_v9, %v635_v48  ;;  %v1564_v47 = vld [vmem:[%s2236_s3 + $0x14] sm:$0xf]  ;;  %v1558_v48 = vld [vmem:[%s2236_s3 + $0xc] sm:$0xf]  ;;  %v870_v9 = vld [vmem:[%s2236_s3] sm:$0xf] }
 0x166   : > { %v849_v14 = vmul.f32 %v847_v10, %v841_v11  ;;  %v850_v15 = vmul.f32 %v847_v10, %v842_v12 }
 0x168   : > { %v858_v17 = vadd.f32 %v856_v13, %v849_v14  ;;  %v859_v20 = vadd.f32 %v856_v13, %v850_v15  ;;  %v1563_v14 = vld [vmem:[%s2236_s3 + $0x10] sm:$0xf]  ;;  %v1569_v15 = vld [vmem:[%s2236_s3 + $0x18] sm:$0xf] }
 0x16a   : > { %v2047_v21 = vmax.f32 %v858_v17, 0.0  ;;  %v2049_v22 = vmax.f32 %v859_v20, 0.0 }
 0x16c   : > { %873 = vrot.lane.b32.xlu1 %v2049_v22, %s1720_s10  ;;  %1001 = vrot.lane.b32.xlu2 %v2047_v21, %s1722_s12 }
 0x16d   : > { %871 = vrot.lane.b32.xlu0 %v2047_v21, %s1720_s10  ;;  %s1672_s10 = scalar_lea.hbm %s1671_s7, 8 }
 0x16e   : > { %p1673_p11 = scmp.ne.s32.totalorder %s1671_s7, %s1672_s10 }
 0x170   : > { %p1674_p12 = pnand %p1673_p11, %p1798_p5 }
 0x172   : > { %p1675_p13 = pneg %p1674_p12 }
 0x174   : > { %940 = vrot.lane.b32.xlu1 %v2047_v21, %s1721_s11  ;;  %942 = vrot.lane.b32.xlu2 %v2049_v22, %s1721_s11 }
 0x175   : > { %1003 = vrot.lane.b32.xlu0 %v2049_v22, %s1722_s12 }
 0x17c   : > { %1131 = vrot.lane.b32.xlu1 %v2049_v22, %s1725_s15  ;;  %1070 = vrot.lane.b32.xlu2 %v2047_v21, %s1723_s13 }
 0x17d   : > { %1129 = vrot.lane.b32.xlu0 %v2047_v21, %s1725_s15  ;;  %s1676_s15 = scalar_lea.hbm %s2238_s5, 16 }
 0x17e   : > { %p1678_p1 = scmp.lt.s32.totalorder %s1676_s15, %s1672_s10 }
 0x180   : > { %p1679_p2 = por %p1678_p1, %p1677_p0 }
 0x182   : > { %p1680_p3 = pnand %p1679_p2, %p1675_p13 }
 0x184   : > { %930 = vrot.lane.b32.xlu1 %v2047_v21, %s1726_s16  ;;  %932 = vrot.lane.b32.xlu2 %v2049_v22, %s1726_s16 }
 0x185   : > { %1072 = vrot.lane.b32.xlu0 %v2049_v22, %s1723_s13 }
 0x18c   : > { %864 = vrot.lane.b32.xlu1 %v2049_v22, %s1724_s14  ;;  %1060 = vrot.lane.b32.xlu2 %v2047_v21, %s1727_s17 }
 0x18d   : > { %862 = vrot.lane.b32.xlu0 %v2047_v21, %s1724_s14  ;;  %s215_s14 = sand.u32 1, %s1710_s19  }
 0x18e   : > { %s1425_s22 = scalar_lea.sflag [#allocation3], %s215_s14 }
 0x194   : > { %1395 = vperm.xlu1 %1653, %v1392_v23   ;;  %1404 = vperm.xlu2 %1654, %v1596_v24  }
 0x195   : > { %1062 = vrot.lane.b32.xlu0 %v2049_v22, %s1727_s17  ;;  %s1504_s17 = sshll.u32 %s215_s14, 3 }
 0x196   : > { %s217_s26 = scalar_lea.vmem [#allocation2], %s1504_s17 }
 0x197   : > { %s1438_s30 = sshll.u32 %s217_s26, 4  ;;  %s1439_s30 = int_to_ptr.vmem [resolvable:$true] %s1438_s30 }
 0x1c6   : > { %v1002_v25 = vpop.permute.xlu2 %1001 }
 0x1ce   : > { %v943_v36 = vpop.permute.xlu2 %942 }
 0x1d6   : > { %v1071_v49 = vpop.permute.xlu2 %1070 }
 0x1de   : > { %v874_v30 = vpop.permute.xlu1 %873  ;;  %v933_v58 = vpop.permute.xlu2 %932 }
 0x1df   : > { %v872_v31 = vpop.permute.xlu0 %871 }
 0x1e0   : > { %v875_v34 = vsel %vm286_vm3, %v872_v31, %v874_v30  ;;  %v876_v19 = vsel %vm286_vm3, %v874_v30, %v872_v31 }
 0x1e1   : > { %v877_v35 = vmul.f32 %v876_v19, %v1871_v29  ;;  %1555 = vmatpush.msk.msra.mxu3 %vm297_vm5, %v875_v34 }
 0x1e2   : > { %1556 = vmatmul.msk.f32.vlgmr.msra.gmra.mxu3 %vm293_vm6, %v1552_v33 }
 0x1e3   : > { %1553 = vmatpush.msk.msra.mxu2 %vm297_vm5, %v877_v35 }
 0x1e4   : > { %1554 = vmatmul.msk.f32.vlgmr.msra.gmra.mxu2 %vm293_vm6, %v1552_v33 }
 0x1e6   : > { %v941_v37 = vpop.permute.xlu1 %940 }
 0x1e7   : > { %v944_v26 = vsel %vm369_vm9, %v941_v37, %v943_v36  ;;  %v945_v38 = vsel %vm369_vm9, %v943_v36, %v941_v37  ;;  %v1004_v39 = vpop.permute.xlu0 %1003 }
 0x1e8   : > { %v946_v40 = vmul.f32 %v945_v38, %v1910_v44  ;;  %v947_v29 = vmul.f32 %v944_v26, %v1915_v45  ;;  %v1005_v41 = vsel %vm436_vm4, %v1002_v25, %v1004_v39  ;;  %v1006_v42 = vsel %vm436_vm4, %v1004_v39, %v1002_v25 }
 0x1e9   : > { %v1007_v43 = vmul.f32 %v1005_v41, %v1866_v28  ;;  %v1008_v46 = vmul.f32 %v1006_v42, %v1861_v27 }
 0x1ea   : > { %1559 = vmatpush.msk.msrb.mxu0 %vm297_vm5, %v946_v40  ;;  %1561 = vmatpush.msk.msrb.mxu1 %vm297_vm5, %v947_v29 }
 0x1eb   : > { %1565 = vmatpush.msk.msrb.mxu2 %vm297_vm5, %v1007_v43  ;;  %1567 = vmatpush.msk.msrb.mxu3 %vm297_vm5, %v1008_v46 }
 0x1ec   : > { %1568 = vmatmul.msk.f32.vlgmr.msrb.gmra.mxu3 %vm293_vm6, %v1564_v47  ;;  %1566 = vmatmul.msk.f32.vlgmr.msrb.gmra.mxu2 %vm293_vm6, %v1564_v47 }
 0x1ed   : > { %1560 = vmatmul.msk.f32.vlgmr.msrb.gmra.mxu0 %vm293_vm6, %v1558_v48  ;;  %1562 = vmatmul.msk.f32.vlgmr.msrb.gmra.mxu1 %vm293_vm6, %v1558_v48 }
 0x1ee   : > { %v1132_v50 = vpop.permute.xlu1 %1131 }
 0x1ef   : > { %v1130_v51 = vpop.permute.xlu0 %1129 }
 0x1f0   : > { %v1133_v52 = vsel %vm582_vm14, %v1130_v51, %v1132_v50  ;;  %v1134_v53 = vsel %vm582_vm14, %v1132_v50, %v1130_v51 }
 0x1f1   : > { %v1135_v54 = vmul.f32 %v1133_v52, %v1866_v28  ;;  %v1136_v55 = vmul.f32 %v1134_v53, %v1967_v2 }
 0x1f3   : > { %1576 = vmatpush.msk.msra.mxu2 %vm297_vm5, %v1135_v54  ;;  %1578 = vmatpush.msk.msra.mxu3 %vm297_vm5, %v1136_v55 }
 0x1f4   : > { %1579 = vmatmul.msk.f32.vlgmr.msra.gmra.mxu3 %vm293_vm6, %v1575_v56  ;;  %1577 = vmatmul.msk.f32.vlgmr.msra.gmra.mxu2 %vm293_vm6, %v1575_v56 }
 0x1f6   : > { %v931_v59 = vpop.permute.xlu1 %930 }
 0x1f7   : > { %v934_v60 = vsel %vm353_vm7, %v931_v59, %v933_v58  ;;  %v935_v28 = vsel %vm353_vm7, %v933_v58, %v931_v59  ;;  %v1073_v2 = vpop.permute.xlu0 %1072  ;;  %v1410_v59 = vld.sshfl [vmem:[#allocation1] sm:$0xff pattern:$0x75316420] }
 0x1f8   : > { %v936_v61 = vmul.f32 %v935_v28, %v2004_v16  ;;  %v937_v62 = vmul.f32 %v934_v60, %v1861_v27  ;;  %v1074_v63 = vsel %vm517_vm11, %v1071_v49, %v1073_v2  ;;  %v1075_v0 = vsel %vm517_vm11, %v1073_v2, %v1071_v49  ;;  %v1557_v16 = vld [vmem:[%s2236_s3 + $0x8] sm:$0xf] }
 0x1f9   : > { %v1077_v4 = vmul.f32 %v1075_v0, %v1942_v57  ;;  %1571 = vmatpush.msk.msra.mxu0 %vm297_vm5, %v1074_v63  ;;  %v1411_v60 = vld.sshfl [vmem:[#allocation1 + $0x8] sm:$0xff pattern:$0x75316420] }
 0x1fa   : > { %1584 = vmatpush.msk.msrb.mxu2 %vm297_vm5, %v936_v61  ;;  %1586 = vmatpush.msk.msrb.mxu3 %vm297_vm5, %v937_v62 }
 0x1fb   : > { %1573 = vmatpush.msk.msra.mxu1 %vm297_vm5, %v1077_v4  ;;  %1572 = vmatmul.msk.f32.vlgmr.msra.gmra.mxu0 %vm293_vm6, %v1570_v1 }
 0x1fc   : > { %1574 = vmatmul.msk.f32.vlgmr.msra.gmra.mxu1 %vm293_vm6, %v1570_v1  ;;  %1587 = vmatmul.msk.f32.vlgmr.msrb.gmra.mxu3 %vm293_vm6, %v1557_v16 }
 0x1fd   : > { %1585 = vmatmul.msk.f32.vlgmr.msrb.gmra.mxu2 %vm293_vm6, %v1557_v16 }
 0x1fe   : > { %v865_v27 = vpop.permute.xlu1 %864 }
 0x1ff   : > { %v863_v57 = vpop.permute.xlu0 %862 }
 0x200   : > { %v866_v5 = vsel %vm271_vm15, %v863_v57, %v865_v27  ;;  %v867_v6 = vsel %vm271_vm15, %v865_v27, %v863_v57 }
 0x201   : > { %v868_v7 = vmul.f32 %v867_v6, %v1970_v3  ;;  %v869_v8 = vmul.f32 %v866_v5, %v1915_v45  ;;  %v1061_v3 = vpop.permute.xlu2 %1060 }
 0x203   : > { %1580 = vmatpush.msk.msrb.mxu0 %vm297_vm5, %v868_v7  ;;  %1582 = vmatpush.msk.msrb.mxu1 %vm297_vm5, %v869_v8 }
 0x204   : > { %1581 = vmatmul.msk.f32.vlgmr.msrb.gmra.mxu0 %vm293_vm6, %v870_v9  ;;  %1583 = vmatmul.msk.f32.vlgmr.msrb.gmra.mxu1 %vm293_vm6, %v870_v9 }
 0x205   : > { %1588 = vmatpush.msk.msra.mxu0 %vm297_vm5, %v2047_v21  ;;  %1590 = vmatpush.msk.msra.mxu1 %vm297_vm5, %v2049_v22 }
 0x206   : > { %v1396_v54 = vpop.permute.xlu1 %1395 }
 0x207   : > { %v1063_v45 = vpop.permute.xlu0 %1062 }
 0x208   : > { %v1064_v10 = vsel %vm501_vm2, %v1061_v3, %v1063_v45  ;;  %v1065_v11 = vsel %vm501_vm2, %v1063_v45, %v1061_v3 }
 0x209   : > { %v1066_v12 = vmul.f32 %v1064_v10, %v1910_v44  ;;  %v1067_v13 = vmul.f32 %v1065_v11, %v2032_v32  ;;  %v1405_v58 = vpop.permute.xlu2 %1404 }
 0x20b   : > { %1592 = vmatpush.msk.msra.mxu2 %vm297_vm5, %v1066_v12  ;;  %1594 = vmatpush.msk.msra.mxu3 %vm297_vm5, %v1067_v13 }
 0x20c   : > { %1589 = vmatmul.msk.f32.vlgmr.msra.gmra.mxu0 %vm293_vm6, %v1563_v14  ;;  %1591 = vmatmul.msk.f32.vlgmr.msra.gmra.mxu1 %vm293_vm6, %v1563_v14 }
 0x20d   : > { %1593 = vmatmul.msk.f32.vlgmr.msra.gmra.mxu2 %vm293_vm6, %v1569_v15  ;;  %1595 = vmatmul.msk.f32.vlgmr.msra.gmra.mxu3 %vm293_vm6, %v1569_v15 }
 0x265   : > { %v927_v18 = vpop.f32.mrf.mxu3 }
 0x267   : > { %v907_v44 = vpop.f32.mrf.mxu2 }
 0x26a   : > { %v976_v32 = vpop.f32.mrf.mxu0  ;;  %v996_v17 = vpop.f32.mrf.mxu1 }
 0x26f   : > { %v1057_v20 = vpop.f32.mrf.mxu3  ;;  %v1037_v21 = vpop.f32.mrf.mxu2 }
 0x277   : > { %v1185_v24 = vpop.f32.mrf.mxu3  ;;  %v1165_v25 = vpop.f32.mrf.mxu2 }
 0x278   : > { %v1106_v22 = vpop.f32.mrf.mxu0 }
 0x279   : > { %v1126_v23 = vpop.f32.mrf.mxu1 }
 0x27f   : > { %v1283_v33 = vpop.f32.mrf.mxu3 }
 0x280   : > { %v1263_v34 = vpop.f32.mrf.mxu2  ;;  %v1284_v26 = vadd.f32 %v1283_v33, %v996_v17 }
 0x281   : > { %v1214_v30 = vpop.f32.mrf.mxu0  ;;  %v1234_v31 = vpop.f32.mrf.mxu1  ;;  %v1264_v38 = vadd.f32 %v1263_v34, %v976_v32 }
 0x282   : > { %v1215_v36 = vadd.f32 %v1214_v30, %v907_v44  ;;  %v1235_v37 = vadd.f32 %v1234_v31, %v927_v18 }
 0x284   : > { %v1384_v46 = vadd.f32 %v1264_v38, %v1215_v36  ;;  %v1385_v47 = vadd.f32 %v1284_v26, %v1235_v37 }
 0x289   : > { %v1312_v19 = vpop.f32.mrf.mxu0  ;;  %v1332_v35 = vpop.f32.mrf.mxu1 }
 0x28a   : > { %v1313_v29 = vadd.f32 %v1312_v19, %v1037_v21  ;;  %v1333_v41 = vadd.f32 %v1332_v35, %v1057_v20 }
 0x290   : > { %v1361_v39 = vpop.f32.mrf.mxu2  ;;  %v1381_v40 = vpop.f32.mrf.mxu3 }
 0x291   : > { %v1362_v42 = vadd.f32 %v1361_v39, %v1106_v22  ;;  %v1382_v43 = vadd.f32 %v1381_v40, %v1126_v23 }
 0x293   : > { %v1386_v48 = vadd.f32 %v1362_v42, %v1313_v29  ;;  %v1387_v49 = vadd.f32 %v1382_v43, %v1333_v41 }
 0x295   : > { %v1388_v50 = vadd.f32 %v1386_v48, %v1384_v46  ;;  %v1389_v51 = vadd.f32 %v1387_v49, %v1385_v47 }
 0x297   : > { %v1390_v52 = vadd.f32 %v1388_v50, %v1165_v25  ;;  %v1391_v53 = vadd.f32 %v1389_v51, %v1185_v24 }
 0x299   : > { %v1398_v55 = vmul.f32 %v1396_v54, %v1390_v52  ;;  %v1399_v56 = vmul.f32 %v1396_v54, %v1391_v53 }
 0x29b   : > { %v1407_v28 = vadd.f32 %v1405_v58, %v1398_v55  ;;  %v1408_v2 = vadd.f32 %v1405_v58, %v1399_v56 }
 0x29d   : > { %v1414_v61 = vadd.f32 %v1410_v59, %v1407_v28  ;;  %v1415_v62 = vadd.f32 %v1411_v60, %v1408_v2 }
 0x29f   : > { %v1417_v63 = vmax.f32 %v1415_v62, 0.0  ;;  %v1416_v0 = vmax.f32 %v1414_v61, 0.0 }
 0x2a1   : > { %v1420_v1 = vrot.slane %v1417_v63, 4 }
 0x2a3   : > { %v1421_v4 = vsel %vm297_vm5, %v1416_v0, %v1420_v1 }
 0x2a4   : > { %1423 = vst [vmem:[%s217_s26] sm:$0xff] %v1421_v4 }
 0x2a5   : > { %1683 = shalt.err (!%p1680_p3)
}
 0x2a6   : > { %1604 = dma.vmem_to_hbm [thread:$0]  (%p1798_p5), %s1439_s30, 128, %s1441_s6, %s1425_s22  }
 0x2a7 PF: > { %p1610_p4 = scmp.ge.s32.totalorder %s1718_s21, 2  ;;  %s1452_s14 = sand.u32 1, %s1706_s18  }
 0x2a8   : > { %s1453_s17 = scalar_lea.sflag [#allocation3], %s1452_s14 }
 0x2a9   : > { %p1607_p7 = pnand %p1610_p4, %p1802_p6 }
 0x2ab   : > { %p1608_p8 = pneg %p1607_p7 }
 0x2ad   : > { %1701 = dma.done.wait (%p1608_p8), %s1453_s17, 128  }
 0x2ae   : > { %1703 = vsyncadd (%p1608_p8), %s1453_s17, 4294967168  ;;  %p15_p9 = scmp.ge.s32.totalorder %s1785_s24, 4   ;;  %s2249_s18 = smov %s1710_s19 }
 0x2af   : > { %s2250_s19 = smov %s1714_s20  ;;  %s2251_s20 = smov %s1796_s27 }
 0x2b0   : > { %s2252_s21 = smov %s1785_s24  ;;  %17 = sbr.rel (!%p15_p9) target bundleno = 3 (0x3), region = 93 }
 0x2b5   :  { %1459 = vsyncpa [#allocation3], 1 }
 0x2b6   :  { %1461 = vsyncpa [#allocation3 + $0x1], 1 }

</bundles_post_ra>
